<compile_context>
chip_gen: v7x
topology: tpu7x:2x2x1
jax: 0.10.0
libtpu: 0.0.40
codegen_flags: <defaults>
</compile_context>

<pallas_src>
import jax
import jax.numpy as jnp
from jax.experimental import pallas as pl
from jax.experimental.pallas import tpu as pltpu

IN_DIM = 120      # PyTorch fc1 in_features (kept un-padded; full-dim block)
HID_DIM = 256
OUT_DIM = 256
TM_MAX = 2048     # batch tile rows (multiple of 8); ~10 MiB VMEM incl. double buffers
MIN_GRID_STEPS = 2  # give v7x's 2 TensorCores work; near-free on v5e/v6e
VMEM_LIMIT_BYTES = 32 << 20  # within default/physical VMEM on v5e/v6e/v7x


def _round_up(n, m):
    return (n + m - 1) // m * m


def _pick_batch_tile(batch):
    """Pick (tm, b_pad, n_tiles) so tiles divide the batch nearly evenly,
    tm <= TM_MAX, tm % 8 == 0, and n_tiles >= MIN_GRID_STEPS when possible."""
    b8 = _round_up(max(batch, 1), 8)
    n_tiles = max(pl.cdiv(b8, TM_MAX), MIN_GRID_STEPS)
    n_tiles = min(n_tiles, b8 // 8)          # each tile needs >= 8 rows
    n_tiles = max(n_tiles, 1)
    tm = _round_up(pl.cdiv(b8, n_tiles), 8)  # <= TM_MAX by construction
    b_pad = n_tiles * tm
    return tm, b_pad, n_tiles


def _mlp_kernel(x_ref, w1_ref, b1_ref, w2_ref, b2_ref, o_ref):
    # x arrives as f32 (no wrapper prep pass); cast to bf16 on the VPU (slack).
    x = x_ref[...].astype(jnp.bfloat16)                          # (tm, 120)
    # fc1: bf16 x bf16 -> f32 accumulate on the MXU, + bias, ReLU.
    h = jnp.dot(x, w1_ref[...], preferred_element_type=jnp.float32)
    h = jnp.maximum(h + b1_ref[...], 0.0)                        # b1 (1, 256) broadcasts
    # fc2: hidden back to bf16 for the MXU, accumulate in f32.
    y = jnp.dot(h.astype(jnp.bfloat16), w2_ref[...],
                preferred_element_type=jnp.float32)
    o_ref[...] = (y + b2_ref[...]).astype(o_ref.dtype)


def projection_cnn_forward(x, w1, b1, w2, b2, *, out_dtype=jnp.float32):
    """x: [B, 120] f32. w1: [120, 256], b1: [256], w2: [256, 256], b2: [256]
    (weights stored [in, out] so the kernel computes x @ W). Returns [B, 256]."""
    B = x.shape[0]

    # Only the tiny weights get a wrapper cast (~180 KiB total); x is untouched.
    w1_b = w1.astype(jnp.bfloat16)
    w2_b = w2.astype(jnp.bfloat16)
    b1_2d = b1.reshape(1, HID_DIM).astype(jnp.float32)
    b2_2d = b2.reshape(1, OUT_DIM).astype(jnp.float32)

    tm, b_pad, n_tiles = _pick_batch_tile(B)
    x_p = jnp.pad(x, ((0, b_pad - B), (0, 0))) if b_pad != B else x
    grid = (n_tiles,)

    out_bytes = jnp.dtype(out_dtype).itemsize
    flops = 2 * b_pad * (IN_DIM * HID_DIM + HID_DIM * OUT_DIM)
    bytes_accessed = (
        b_pad * IN_DIM * 4              # x (f32, read once)
        + IN_DIM * HID_DIM * 2          # w1 (bf16)
        + HID_DIM * OUT_DIM * 2         # w2 (bf16)
        + (HID_DIM + OUT_DIM) * 4       # biases (f32)
        + b_pad * OUT_DIM * out_bytes   # output
    )

    out = pl.pallas_call(
        _mlp_kernel,
        out_shape=jax.ShapeDtypeStruct((b_pad, OUT_DIM), out_dtype),
        grid_spec=pltpu.PrefetchScalarGridSpec(
            num_scalar_prefetch=0,
            grid=grid,
            in_specs=[
                pl.BlockSpec((tm, IN_DIM), lambda i: (i, 0)),         # x: tiled over batch
                pl.BlockSpec((IN_DIM, HID_DIM), lambda i: (0, 0)),    # w1: VMEM-resident
                pl.BlockSpec((1, HID_DIM), lambda i: (0, 0)),         # b1: VMEM-resident
                pl.BlockSpec((HID_DIM, OUT_DIM), lambda i: (0, 0)),   # w2: VMEM-resident
                pl.BlockSpec((1, OUT_DIM), lambda i: (0, 0)),         # b2: VMEM-resident
            ],
            out_specs=pl.BlockSpec((tm, OUT_DIM), lambda i: (i, 0)),
        ),
        compiler_params=pltpu.CompilerParams(
            dimension_semantics=("parallel",),   # batch tiles independent -> v7x megacore
            vmem_limit_bytes=VMEM_LIMIT_BYTES,
        ),
        cost_estimate=pl.CostEstimate(
            flops=flops, transcendentals=0, bytes_accessed=bytes_accessed),
    )(x_p, w1_b, b1_2d, w2_b, b2_2d)

    return out[:B]


def _init_linear(key, fan_in, fan_out):
    # Mimics PyTorch nn.Linear default init: U(-1/sqrt(fan_in), +1/sqrt(fan_in)).
    kw, kb = jax.random.split(key)
    bound = 1.0 / jnp.sqrt(jnp.float32(fan_in))
    # PyTorch weight is [out, in]; we store transposed [in, out] for x @ W.
    w = jax.random.uniform(kw, (fan_in, fan_out), jnp.float32, -bound, bound)
    b = jax.random.uniform(kb, (fan_out,), jnp.float32, -bound, bound)
    return w, b


def _reference(x, w1, b1, w2, b2):
    # Matches the kernel's numerics: bf16 matmul inputs, f32 accumulation.
    # NOTE: a true f32 PyTorch ProjectionCnn differs by ~1e-2 rel (bf16 contract).
    xb = x.astype(jnp.bfloat16).astype(jnp.float32)
    w1b = w1.astype(jnp.bfloat16).astype(jnp.float32)
    w2b = w2.astype(jnp.bfloat16).astype(jnp.float32)
    h = jnp.maximum(xb @ w1b + b1, 0.0)
    hb = h.astype(jnp.bfloat16).astype(jnp.float32)
    return hb @ w2b + b2


if __name__ == "__main__":
    key = jax.random.PRNGKey(0)
    k_x, k_fc1, k_fc2, k_x2 = jax.random.split(key, 4)

    w1, b1 = _init_linear(k_fc1, IN_DIM, HID_DIM)
    w2, b2 = _init_linear(k_fc2, HID_DIM, OUT_DIM)

    # Small single-tile run.
    B = 8
    x = jax.random.normal(k_x, (B, IN_DIM), jnp.float32)
    out = jax.block_until_ready(projection_cnn_forward(x, w1, b1, w2, b2))
    ref = _reference(x, w1, b1, w2, b2)
    assert out.shape == (B, OUT_DIM)
    assert out.dtype == jnp.float32
    assert jnp.allclose(out, ref, atol=1e-2, rtol=1e-2), "mismatch vs reference (B=8)"

    # Non-multiple-of-8 batch: exercises padding + the 2-tile (megacore-friendly) path.
    B2 = 13
    x2 = jax.random.normal(k_x2, (B2, IN_DIM), jnp.float32)
    out2 = jax.block_until_ready(projection_cnn_forward(x2, w1, b1, w2, b2))
    ref2 = _reference(x2, w1, b1, w2, b2)
    assert out2.shape == (B2, OUT_DIM)
    assert jnp.allclose(out2, ref2, atol=1e-2, rtol=1e-2), "mismatch vs reference (B=13)"

    print("KERNEL_OK")
</pallas_src>

<mosaic_0001>
module attributes {stable_mosaic.version = 11 : i64} {
  func.func @_mlp_kernel(%arg0: i32, %arg1: memref<8x120xf32, #tpu.memory_space<vmem>>, %arg2: memref<120x256xbf16, #tpu.memory_space<vmem>>, %arg3: memref<1x256xf32, #tpu.memory_space<vmem>>, %arg4: memref<256x256xbf16, #tpu.memory_space<vmem>>, %arg5: memref<1x256xf32, #tpu.memory_space<vmem>>, %arg6: memref<8x256xf32, #tpu.memory_space<vmem>>) attributes {dimension_semantics = [#tpu.dimension_semantics<parallel>], iteration_bounds = array<i64: 1>, scalar_prefetch = 0 : i64, scratch_operands = 0 : i64, tpu.core_type = #tpu.core_type<tc>, window_params = [{transform_indices = @transform_0, window_bounds = array<i64: 8, 120>}, {pipeline_mode = #tpu.pipeline_mode<synchronous>, transform_indices = @transform_1, window_bounds = array<i64: 120, 256>}, {pipeline_mode = #tpu.pipeline_mode<synchronous>, transform_indices = @transform_2, window_bounds = array<i64: 1, 256>}, {pipeline_mode = #tpu.pipeline_mode<synchronous>, transform_indices = @transform_3, window_bounds = array<i64: 256, 256>}, {pipeline_mode = #tpu.pipeline_mode<synchronous>, transform_indices = @transform_4, window_bounds = array<i64: 1, 256>}, {transform_indices = @transform_5, window_bounds = array<i64: 8, 256>}]} {
    %c0 = arith.constant 0 : index
    %c0_0 = arith.constant 0 : index
    %0 = vector.load %arg1[%c0, %c0_0] : memref<8x120xf32, #tpu.memory_space<vmem>>, vector<8x120xf32>
    %1 = arith.truncf %0 : vector<8x120xf32> to vector<8x120xbf16>
    %c0_1 = arith.constant 0 : index
    %c0_2 = arith.constant 0 : index
    %2 = vector.load %arg2[%c0_1, %c0_2] : memref<120x256xbf16, #tpu.memory_space<vmem>>, vector<120x256xbf16>
    %cst = arith.constant dense<0.000000e+00> : vector<8x256xf32>
    %3 = tpu.matmul %1, %2, %cst {dimension_numbers = #tpu.dot_dimension_numbers<[1], [0], [0], [1], [0, 0, 1, 1], [], []>} : vector<8x120xbf16>, vector<120x256xbf16>, vector<8x256xf32> -> vector<8x256xf32>
    %c0_3 = arith.constant 0 : index
    %c0_4 = arith.constant 0 : index
    %4 = vector.load %arg3[%c0_3, %c0_4] : memref<1x256xf32, #tpu.memory_space<vmem>>, vector<1x256xf32>
    %5 = vector.broadcast %4 : vector<1x256xf32> to vector<8x256xf32>
    %6 = arith.addf %3, %5 : vector<8x256xf32>
    %cst_5 = arith.constant 0.000000e+00 : f32
    %7 = vector.broadcast %cst_5 : f32 to vector<8x256xf32>
    %8 = arith.maximumf %6, %7 : vector<8x256xf32>
    %9 = arith.truncf %8 : vector<8x256xf32> to vector<8x256xbf16>
    %c0_6 = arith.constant 0 : index
    %c0_7 = arith.constant 0 : index
    %10 = vector.load %arg4[%c0_6, %c0_7] : memref<256x256xbf16, #tpu.memory_space<vmem>>, vector<256x256xbf16>
    %cst_8 = arith.constant dense<0.000000e+00> : vector<8x256xf32>
    %11 = tpu.matmul %9, %10, %cst_8 {dimension_numbers = #tpu.dot_dimension_numbers<[1], [0], [0], [1], [0, 0, 1, 1], [], []>} : vector<8x256xbf16>, vector<256x256xbf16>, vector<8x256xf32> -> vector<8x256xf32>
    %c0_9 = arith.constant 0 : index
    %c0_10 = arith.constant 0 : index
    %12 = vector.load %arg5[%c0_9, %c0_10] : memref<1x256xf32, #tpu.memory_space<vmem>>, vector<1x256xf32>
    %13 = vector.broadcast %12 : vector<1x256xf32> to vector<8x256xf32>
    %14 = arith.addf %11, %13 : vector<8x256xf32>
    %c0_11 = arith.constant 0 : index
    %c0_12 = arith.constant 0 : index
    %15 = vector.load %arg6[%c0_11, %c0_12] : memref<8x256xf32, #tpu.memory_space<vmem>>, vector<8x256xf32>
    tpu.vector_store %arg6[%c0_11, %c0_12], %14 {strides = array<i32>} : memref<8x256xf32, #tpu.memory_space<vmem>>, vector<8x256xf32>,
    return
  }
  func.func @transform_0(%arg0: i32) -> (i32, i32) {
    %c0_i32 = arith.constant 0 : i32
    %c0_i32_0 = arith.constant 0 : i32
    return %arg0, %c0_i32 : i32, i32
  }
  func.func @transform_1(%arg0: i32) -> (i32, i32) {
    %c0_i32 = arith.constant 0 : i32
    %c0_i32_0 = arith.constant 0 : i32
    %c0_i32_1 = arith.constant 0 : i32
    return %c0_i32, %c0_i32_0 : i32, i32
  }
  func.func @transform_2(%arg0: i32) -> (i32, i32) {
    %c0_i32 = arith.constant 0 : i32
    %c0_i32_0 = arith.constant 0 : i32
    %c0_i32_1 = arith.constant 0 : i32
    return %c0_i32, %c0_i32_0 : i32, i32
  }
  func.func @transform_3(%arg0: i32) -> (i32, i32) {
    %c0_i32 = arith.constant 0 : i32
    %c0_i32_0 = arith.constant 0 : i32
    %c0_i32_1 = arith.constant 0 : i32
    return %c0_i32, %c0_i32_0 : i32, i32
  }
  func.func @transform_4(%arg0: i32) -> (i32, i32) {
    %c0_i32 = arith.constant 0 : i32
    %c0_i32_0 = arith.constant 0 : i32
    %c0_i32_1 = arith.constant 0 : i32
    return %c0_i32, %c0_i32_0 : i32, i32
  }
  func.func @transform_5(%arg0: i32) -> (i32, i32) {
    %c0_i32 = arith.constant 0 : i32
    %c0_i32_0 = arith.constant 0 : i32
    return %arg0, %c0_i32 : i32, i32
  }
}

</mosaic_0001>

<bundles_post_ra>
// kernel: tpu_custom_call.1
= control target key start
LH: loop header
LB: loop body
LE: loop exit
PB: predicated region body
PF: predicated region fallthrough
CT: control target
= control target key end

     0   :  { %10 = vsyncpa [#allocation3], 0  ;;  %s803_s0 = inlined_call_operand.hbm [shape: f32[8,120], index: 0, kind: input, shape index: {}]   ;;  %s804_s1 = inlined_call_operand.hbm [shape: bf16[120,256], index: 1, kind: input, shape index: {}]   ;;  %s805_s2 = inlined_call_operand.vmem [shape: f32[1,256], index: 2, kind: input, shape index: {}]   ;;  %s806_s3 = inlined_call_operand.hbm [shape: bf16[256,256], index: 3, kind: input, shape index: {}]   ;;  %s807_s4 = inlined_call_operand.vmem [shape: f32[1,256], index: 4, kind: input, shape index: {}]   ;;  %s808_s5 = inlined_call_operand.hbm [shape: f32[8,256], index: 5, kind: output, shape index: {}]  }
   0x1   :  { %11 = vsyncpa [#allocation6], 0 }
   0x2   :  { %12 = vsyncpa [#allocation4], 0  ;;  %s706_s18 = smov [#allocation5]   ;;  %s612_s22 = scalar_lea.hbm %s804_s1, 1920 }
   0x3   :  { %s28_s19 = sshll.u32 %s706_s18, 4  ;;  %p613_p0 = scmp.ne.s32.totalorder %s804_s1, %s612_s22  ;;  %s29_s19 = int_to_ptr.vmem [resolvable:$true] %s28_s19 }
   0x4   :  { %p616_p1 = scmp.lt.u32.totalorder %s612_s22, %s804_s1 }
   0x6   :  { %p618_p2 = pnand %p616_p1, %p613_p0 }
   0x8   :  { %621 = shalt.err (!%p618_p2)
}
   0x9   :  { %s622_s27 = scalar_lea.vmem %s29_s19, 1920  ;;  %p627_p4 = scmp.lt.s32.totalorder %s29_s19, %s29_s19 }
   0xa   :  { %p623_p3 = scmp.ne.s32.totalorder %s29_s19, %s622_s27  ;;  %p628_p5 = scmp.lt.s32.totalorder %s622_s27, %s622_s27 }
   0xc   :  { %p629_p6 = por %p628_p5, %p627_p4 }
   0xe   :  { %p630_p7 = pnand %p629_p6, %p623_p3 }
  0x10   :  { %633 = shalt.err (!%p630_p7)
}
  0x11   :  { %s707_s28 = smov 128   ;;  %s708_s29 = smov 8  }
  0x12   :  { %34 = dma.hbm_to_vmem [thread:$0]  %s804_s1, 1920, %s29_s19, [#allocation6], %s707_s28, %s707_s28, %s708_s29  }
  0x13   :  { %s709_s7 = smov [#allocation2]   ;;  %s710_s9 = smov [#allocation7]  }
  0x14   :  { %s19_s8 = sshll.u32 %s709_s7, 4  ;;  %s42_s10 = sshll.u32 %s710_s9, 4  ;;  %s20_s8 = int_to_ptr.vmem [resolvable:$true] %s19_s8  ;;  %s43_s10 = int_to_ptr.vmem [resolvable:$true] %s42_s10 }
  0x15   :  { %s634_s13 = scalar_lea.hbm %s803_s0, 128 }
  0x16   :  { %p635_p8 = scmp.ne.s32.totalorder %s803_s0, %s634_s13  ;;  %p638_p9 = scmp.lt.u32.totalorder %s634_s13, %s803_s0 }
  0x18   :  { %p640_p10 = pnand %p638_p9, %p635_p8 }
  0x1a   :  { %643 = shalt.err (!%p640_p10)
}
  0x1b   :  { %s644_s1 = scalar_lea.vmem %s20_s8, 128  ;;  %p649_p12 = scmp.lt.s32.totalorder %s20_s8, %s20_s8 }
  0x1c   :  { %p645_p11 = scmp.ne.s32.totalorder %s20_s8, %s644_s1  ;;  %p650_p13 = scmp.lt.s32.totalorder %s644_s1, %s644_s1 }
  0x1e   :  { %p651_p0 = por %p650_p13, %p649_p12 }
  0x20   :  { %p652_p1 = pnand %p651_p0, %p645_p11 }
  0x22   :  { %655 = shalt.err (!%p652_p1)
}
  0x23   :  { %22 = dma.hbm_to_vmem [thread:$0]  %s803_s0, 128, %s20_s8, [#allocation3]  }
  0x24   :  { %s656_s22 = scalar_lea.hbm %s806_s3, 4096 }
  0x25   :  { %p657_p2 = scmp.ne.s32.totalorder %s806_s3, %s656_s22  ;;  %p660_p3 = scmp.lt.u32.totalorder %s656_s22, %s806_s3 }
  0x27   :  { %p662_p4 = pnand %p660_p3, %p657_p2 }
  0x29   :  { %665 = shalt.err (!%p662_p4)
}
  0x2a   :  { %s666_s27 = scalar_lea.vmem %s43_s10, 4096  ;;  %p671_p6 = scmp.lt.s32.totalorder %s43_s10, %s43_s10 }
  0x2b   :  { %p667_p5 = scmp.ne.s32.totalorder %s43_s10, %s666_s27  ;;  %p672_p7 = scmp.lt.s32.totalorder %s666_s27, %s666_s27 }
  0x2d   :  { %p673_p8 = por %p672_p7, %p671_p6 }
  0x2f   :  { %p674_p9 = pnand %p673_p8, %p667_p5 }
  0x31   :  { %677 = shalt.err (!%p674_p9)
}
  0x32   :  { %48 = dma.hbm_to_vmem [thread:$0]  %s806_s3, 4096, %s43_s10, [#allocation6], %s707_s28, %s707_s28, %s708_s29  }
  0x33   :  { %700 = dma.done.wait [#allocation3], 128  }
  0x34   :  { %701 = vsyncadd [#allocation3], 4294967168 }
  0x35   :  { %702 = dma.done.wait [#allocation6], 6016  }
  0x36   :  { %703 = vsyncadd [#allocation6], 4294961280  ;;  %v711_v0 = vmov 0   ;;  %v541_v1 = vld [vmem:[#allocation5 + $0x4] ss:$8 sps:$4 sm:$0xff]   ;;  %v77_v21 = vld [vmem:[#allocation5 + $0x70] sm:$0xff]  ;;  %v80_v53 = vlaneseq }
  0x37   :  { %208 = vmatprep.mubr.bf16.mxu0 %v711_v0  ;;  %v543_v2 = vld [vmem:[#allocation5] ss:$8 sps:$4 sm:$0xff]   ;;  %176 = vmatprep.subr.bf16.mxu0 %v541_v1  ;;  %v544_v3 = vld [vmem:[#allocation5 + $0x14] ss:$8 sps:$4 sm:$0xff]   ;;  %v546_v4 = vld [vmem:[#allocation5 + $0x10] ss:$8 sps:$4 sm:$0xff]   ;;  %v499_v25 = vcombine.high %v77_v21, %v77_v21  ;;  %v498_v26 = vcombine.low %v77_v21, %v77_v21 }
  0x38   :  { %177 = vmatpush1.bf16.msra.mxu0 %v543_v2  ;;  %v547_v5 = vld [vmem:[#allocation5 + $0x24] ss:$8 sps:$4 sm:$0xff]   ;;  %v549_v6 = vld [vmem:[#allocation5 + $0x20] ss:$8 sps:$4 sm:$0xff]   ;;  %v550_v7 = vld [vmem:[#allocation5 + $0x34] ss:$8 sps:$4 sm:$0xff]  }
  0x39   :  { %178 = vmatprep.subr.bf16.mxu0 %v544_v3  ;;  %v552_v8 = vld [vmem:[#allocation5 + $0x30] ss:$8 sps:$4 sm:$0xff]   ;;  %v564_v9 = vld [vmem:[#allocation7 + $0x4] ss:$8 sps:$4 sm:$0xff]   ;;  %v567_v12 = vld [vmem:[#allocation7 + $0x14] ss:$8 sps:$4 sm:$0xff]  }
  0x3a   :  { %v566_v10 = vld [vmem:[#allocation7] ss:$8 sps:$4 sm:$0xff]   ;;  %v553_v11 = vld [vmem:[#allocation5 + $0x44] ss:$8 sps:$4 sm:$0xff]   ;;  %425 = vmatprep.subr.bf16.mxu1 %v564_v9  ;;  %v569_v13 = vld [vmem:[#allocation7 + $0x10] ss:$8 sps:$4 sm:$0xff]  }
  0x3b   :  { %426 = vmatpush1.bf16.msra.mxu1 %v566_v10  ;;  %v570_v14 = vld [vmem:[#allocation7 + $0x24] ss:$8 sps:$4 sm:$0xff]   ;;  %v555_v15 = vld [vmem:[#allocation5 + $0x40] ss:$8 sps:$4 sm:$0xff]   ;;  %v573_v18 = vld [vmem:[#allocation7 + $0x34] ss:$8 sps:$4 sm:$0xff]  }
  0x3c   :  { %179 = vmatpush1.bf16.msra.mxu0 %v546_v4  ;;  %427 = vmatprep.subr.bf16.mxu1 %v567_v12  ;;  %v556_v16 = vld [vmem:[#allocation5 + $0x54] ss:$8 sps:$4 sm:$0xff]   ;;  %v572_v17 = vld [vmem:[#allocation7 + $0x20] ss:$8 sps:$4 sm:$0xff]   ;;  %v559_v20 = vld [vmem:[#allocation5 + $0x64] ss:$8 sps:$4 sm:$0xff]  }
  0x3d   :  { %180 = vmatprep.subr.bf16.mxu0 %v547_v5  ;;  %v558_v19 = vld [vmem:[#allocation5 + $0x50] ss:$8 sps:$4 sm:$0xff]   ;;  %v576_v23 = vld [vmem:[#allocation7 + $0x44] ss:$8 sps:$4 sm:$0xff]   ;;  %v561_v24 = vld [vmem:[#allocation5 + $0x60] ss:$8 sps:$4 sm:$0xff]  }
  0x3e   :  { %v575_v22 = vld [vmem:[#allocation7 + $0x30] ss:$8 sps:$4 sm:$0xff]   ;;  %vm169_vm0 = vcmask 1043456   ;;  %v578_v27 = vld [vmem:[#allocation7 + $0x40] ss:$8 sps:$4 sm:$0xff]   ;;  %vm165_vm1 = vcmask 982016  }
  0x3f   :  { %428 = vmatpush1.bf16.msra.mxu1 %v569_v13  ;;  %v579_v28 = vld [vmem:[#allocation7 + $0x54] ss:$8 sps:$4 sm:$0xff]   ;;  %v61_v29 = vld [vmem:[#allocation2] sm:$0xff]  ;;  %v171_v30 = vsel %vm169_vm0, %v498_v26, 0  ;;  %v581_v31 = vld [vmem:[#allocation7 + $0x50] ss:$8 sps:$4 sm:$0xff]  }
  0x40   :  { %181 = vmatpush1.bf16.msra.mxu0 %v549_v6  ;;  %429 = vmatprep.subr.bf16.mxu1 %v570_v14  ;;  %v62_v32 = vpack.c.bf16 %v61_v29, %v61_v29  ;;  %v582_v33 = vld [vmem:[#allocation7 + $0x64] ss:$8 sps:$4 sm:$0xff]   ;;  %v584_v34 = vld [vmem:[#allocation7 + $0x60] ss:$8 sps:$4 sm:$0xff]   ;;  %v585_v35 = vld [vmem:[#allocation7 + $0x74] ss:$8 sps:$4 sm:$0xff]  }
  0x41   :  { %182 = vmatprep.subr.bf16.mxu0 %v550_v7  ;;  %v587_v36 = vld [vmem:[#allocation7 + $0x70] ss:$8 sps:$4 sm:$0xff]   ;;  %v588_v37 = vld [vmem:[#allocation7 + $0x84] ss:$8 sps:$4 sm:$0xff]   ;;  %v590_v38 = vld [vmem:[#allocation7 + $0x80] ss:$8 sps:$4 sm:$0xff]  }
  0x42   :  { %v591_v39 = vld [vmem:[#allocation7 + $0x94] ss:$8 sps:$4 sm:$0xff]   ;;  %v593_v40 = vld [vmem:[#allocation7 + $0x90] ss:$8 sps:$4 sm:$0xff]   ;;  %v594_v41 = vld [vmem:[#allocation7 + $0xa4] ss:$8 sps:$4 sm:$0xff]  }
  0x43   :  { %430 = vmatpush1.bf16.msra.mxu1 %v572_v17  ;;  %v596_v42 = vld [vmem:[#allocation7 + $0xa0] ss:$8 sps:$4 sm:$0xff]   ;;  %v597_v43 = vld [vmem:[#allocation7 + $0xb4] ss:$8 sps:$4 sm:$0xff]   ;;  %v599_v44 = vld [vmem:[#allocation7 + $0xb0] ss:$8 sps:$4 sm:$0xff]  }
  0x44   :  { %183 = vmatpush1.bf16.msra.mxu0 %v552_v8  ;;  %431 = vmatprep.subr.bf16.mxu1 %v573_v18  ;;  %v600_v45 = vld [vmem:[#allocation7 + $0xc4] ss:$8 sps:$4 sm:$0xff]   ;;  %v602_v46 = vld [vmem:[#allocation7 + $0xc0] ss:$8 sps:$4 sm:$0xff]   ;;  %v603_v47 = vld [vmem:[#allocation7 + $0xd4] ss:$8 sps:$4 sm:$0xff]  }
  0x45   :  { %184 = vmatprep.subr.bf16.mxu0 %v553_v11  ;;  %v605_v48 = vld [vmem:[#allocation7 + $0xd0] ss:$8 sps:$4 sm:$0xff]   ;;  %v606_v49 = vld [vmem:[#allocation7 + $0xe4] ss:$8 sps:$4 sm:$0xff]   ;;  %v608_v50 = vld [vmem:[#allocation7 + $0xe0] ss:$8 sps:$4 sm:$0xff]  }
  0x46   :  { %v609_v51 = vld [vmem:[#allocation7 + $0xf4] ss:$8 sps:$4 sm:$0xff]   ;;  %v611_v52 = vld [vmem:[#allocation7 + $0xf0] ss:$8 sps:$4 sm:$0xff]   ;;  %v81_v54 = vshrl.u32 %v80_v53, 7 }
  0x47   :  { %432 = vmatpush1.bf16.msra.mxu1 %v575_v22  ;;  %v78_v56 = vld [vmem:[%s805_s2] sm:$0x3]  ;;  %s712_s2 = smov [#allocation8]  }
  0x48   :  { %185 = vmatpush1.bf16.msra.mxu0 %v555_v15  ;;  %433 = vmatprep.subr.bf16.mxu1 %v576_v23  ;;  %v82_v55 = vsub.s32 0, %v81_v54  ;;  %v86_v57 = vsub.s32 1, %v81_v54  ;;  %v253_v6 = vld [vmem:[%s807_s4] sm:$0x3]  ;;  %s474_s7 = sshll.u32 %s712_s2, 4  ;;  %s475_s7 = int_to_ptr.vmem [resolvable:$true] %s474_s7 }
  0x49   :  { %186 = vmatprep.subr.bf16.mxu0 %v556_v16  ;;  %s678_s8 = scalar_lea.vmem %s475_s7, 256  ;;  %p683_p11 = scmp.lt.s32.totalorder %s475_s7, %s475_s7 }
  0x4a   :  { %v83_v58 = vrot.slane %v78_v56, %v82_v55  ;;  %v87_v59 = vrot.slane %v78_v56, %v86_v57  ;;  %v258_v7 = vrot.slane %v253_v6, %v82_v55  ;;  %v262_v8 = vrot.slane %v253_v6, %v86_v57  ;;  %p679_p10 = scmp.ne.s32.totalorder %s475_s7, %s678_s8  ;;  %p684_p12 = scmp.lt.s32.totalorder %s678_s8, %s678_s8 }
  0x4b   :  { %434 = vmatpush1.bf16.msra.mxu1 %v578_v27 }
  0x4c   :  { %187 = vmatpush1.bf16.msra.mxu0 %v558_v19  ;;  %435 = vmatprep.subr.bf16.mxu1 %v579_v28  ;;  %p685_p13 = por %p684_p12, %p683_p11 }
  0x4d   :  { %188 = vmatprep.subr.bf16.mxu0 %v559_v20 }
  0x4e   :  { %p686_p0 = pnand %p685_p13, %p679_p10 }
  0x4f   :  { %436 = vmatpush1.bf16.msra.mxu1 %v581_v31 }
  0x50   :  { %189 = vmatpush1.bf16.msra.mxu0 %v561_v24  ;;  %437 = vmatprep.subr.bf16.mxu1 %v582_v33 }
  0x51   :  { %500 = vmatprep.subr.msk.bf16.mxu0 %vm169_vm0, %v499_v25 }
  0x53   :  { %438 = vmatpush1.bf16.msra.mxu1 %v584_v34 }
  0x54   :  { %191 = vmatpush1.bf16.msra.mxu0 %v171_v30  ;;  %439 = vmatprep.subr.bf16.mxu1 %v585_v35 }
  0x57   :  { %501 = vmatmul.mubr.msk.bf16.vlgmr.msra.gmra.mrb[0].mxu0 %vm165_vm1, %v62_v32  ;;  %440 = vmatpush1.bf16.msra.mxu1 %v587_v36 }
  0x58   :  { %441 = vmatprep.subr.bf16.mxu1 %v588_v37 }
  0x5b   :  { %442 = vmatpush1.bf16.msra.mxu1 %v590_v38 }
  0x5c   :  { %443 = vmatprep.subr.bf16.mxu1 %v591_v39 }
  0x5f   :  { %444 = vmatpush1.bf16.msra.mxu1 %v593_v40 }
  0x60   :  { %445 = vmatprep.subr.bf16.mxu1 %v594_v41 }
  0x63   :  { %446 = vmatpush1.bf16.msra.mxu1 %v596_v42 }
  0x64   :  { %447 = vmatprep.subr.bf16.mxu1 %v597_v43 }
  0x67   :  { %448 = vmatpush1.bf16.msra.mxu1 %v599_v44 }
  0x68   :  { %449 = vmatprep.subr.bf16.mxu1 %v600_v45 }
  0x6b   :  { %450 = vmatpush1.bf16.msra.mxu1 %v602_v46 }
  0x6c   :  { %451 = vmatprep.subr.bf16.mxu1 %v603_v47 }
  0x6f   :  { %452 = vmatpush1.bf16.msra.mxu1 %v605_v48 }
  0x70   :  { %453 = vmatprep.subr.bf16.mxu1 %v606_v49 }
  0x73   :  { %454 = vmatpush1.bf16.msra.mxu1 %v608_v50 }
  0x74   :  { %455 = vmatprep.subr.bf16.mxu1 %v609_v51 }
  0x77   :  { %456 = vmatpush1.bf16.msra.mxu1 %v611_v52 }
 0x12a   :  { %v210_v60 = vpop.f32.mrb[0].mxu0 }
 0x12b   :  { %v211_v61 = vadd.f32 %v210_v60, %v83_v58  ;;  %v212_v62 = vpop.f32.mrb[1].mxu0 }
 0x12c   :  { %v213_v63 = vadd.f32 %v212_v62, %v87_v59  ;;  %v214_v0 = vpop.f32.mrb[2].mxu0 }
 0x12d   :  { %v217_v1 = vmax.f32 %v211_v61, 0.0  ;;  %v215_v2 = vpop.f32.mrb[3].mxu0 }
 0x12e   :  { %v218_v3 = vmax.f32 %v213_v63, 0.0 }
 0x12f   :  { %v219_v5 = vpack.c.bf16 %v217_v1, %v217_v1 }
 0x130   :  { %v220_v4 = vpack.c.bf16 %v218_v3, %v218_v3 }
 0x132   :  { %457 = vmatprep.mubr.bf16.mxu1 %v220_v4 }
 0x133   :  { %458 = vmatmul.mubr.bf16.vlgmr.msra.gmra.mrb[0].mxu1 %v219_v5 }
 0x206   :  { %v459_v9 = vpop.f32.mrb[0].mxu1 }
 0x207   :  { %v460_v10 = vadd.f32 %v459_v9, %v258_v7  ;;  %v461_v11 = vpop.f32.mrb[1].mxu1 }
 0x208   :  { %v462_v12 = vadd.f32 %v461_v11, %v262_v8  ;;  %v463_v13 = vpop.f32.mrb[2].mxu1 }
 0x209   :  { %466 = vst [vmem:[#allocation8] sm:$0xff] %v460_v10  ;;  %v464_v14 = vpop.f32.mrb[3].mxu1 }
 0x20a   :  { %467 = vst [vmem:[#allocation8 + $0x8] sm:$0xff] %v462_v12 }
 0x20b   :  { %689 = shalt.err (!%p686_p0)
}
 0x20c   :  { %s690_s10 = scalar_lea.hbm %s808_s5, 256 }
 0x20d   :  { %p691_p1 = scmp.ne.s32.totalorder %s808_s5, %s690_s10  ;;  %p694_p2 = scmp.lt.u32.totalorder %s690_s10, %s808_s5 }
 0x20f   :  { %p696_p3 = pnand %p694_p2, %p691_p1 }
 0x211   :  { %699 = shalt.err (!%p696_p3)
}
 0x212   :  { %477 = dma.vmem_to_hbm [thread:$0]  %s475_s7, 256, %s808_s5, [#allocation4]  }
 0x213   :  { %704 = dma.done.wait [#allocation4], 256  }
 0x214   :  { %705 = vsyncadd [#allocation4], 4294967040 }
 0x215   :  { %481 = vsyncpa [#allocation3], 1 }
 0x216   :  { %482 = vsyncpa [#allocation6], 1 }
 0x217   :  { %483 = vsyncpa [#allocation4], 1 }

</bundles_post_ra>
